<compile_context>
chip_gen: v7x
topology: tpu7x:2x2x1
jax: 0.10.0
libtpu: 0.0.40
codegen_flags: <defaults>
</compile_context>

<pallas_src>
from functools import partial

import jax
import jax.numpy as jnp
from jax.experimental import pallas as pl
from jax.experimental.pallas import tpu as pltpu


_PALLAS_MIN_PIXELS = 1024   # below this, the whole scale is launch overhead


def _round_up(x, m):
    return ((x + m - 1) // m) * m


def _vmem_capacity_bytes():
    try:
        return int(pltpu.get_tpu_info().vmem_capacity_bytes)
    except Exception:
        return 64 * 1024 * 1024       # conservative fallback: v7x per-TC VMEM


def _vmem_limit_bytes():
    cap = _vmem_capacity_bytes()
    # ~20% headroom for Mosaic-internal scratch / semaphores / IO staging,
    # and never ask for more than 100 MiB even on 128 MiB parts (v5e/v6e).
    return int(min(int(cap * 0.8), 100 * 1024 * 1024))


def _plan_tiles(c, hw, x_dtype, t_dtype, vmem_limit, max_tile_p):
    """Pick the pixel-tile size and the (splits, tiles_per_split) grid layout."""
    x_bytes = jnp.dtype(x_dtype).itemsize
    t_bytes = jnp.dtype(t_dtype).itemsize

    # Sublane padding in VMEM: the second-to-last block dim pads to 8 rows for
    # 4-byte dtypes, 16 for 2-byte, 32 for 1-byte.
    c_pad_in = _round_up(c, 8 * 4 // x_bytes)
    c_pad_f32 = _round_up(c, 8)
    t_rows_pad = 8 * 4 // t_bytes

    # Per-pixel (lane) VMEM bytes:
    #   2x double-buffered input blocks (logits + labels, sublane-padded)
    # + ~7 full (C_pad, tile) f32/i32 elementwise temporaries
    #   (x_f32, z, exp(z), class iota, mask, 2x where)
    # + ~12 (8, tile)-padded f32/i32 lane-wise temporaries
    # + 2 double-buffered (8, tile)-padded f32 output accumulator blocks
    per_pixel = (2 * (c_pad_in * x_bytes + t_rows_pad * t_bytes)
                 + 7 * c_pad_f32 * 4
                 + 12 * 8 * 4
                 + 2 * 2 * 8 * 4)

    budget = int(vmem_limit * 0.85)
    tile = (budget // per_pixel // 128) * 128
    cap = 65536 if max_tile_p is None else int(max_tile_p)
    tile = max(128, min(tile, cap, _round_up(hw, 128)))

    num_tiles = int(pl.cdiv(hw, tile))
    # Prefer an even tile count so the pixel range can be split into two
    # independent accumulator columns -> both v7x TensorCores stay busy even
    # when N==1. On single-core v5e/v6e this changes nothing (same step count).
    if num_tiles > 1 and num_tiles % 2 == 1:
        tile = min(tile, max(128, _round_up(int(pl.cdiv(hw, num_tiles + 1)), 128)))
        num_tiles = int(pl.cdiv(hw, tile))
    num_splits = 2 if (num_tiles >= 2 and num_tiles % 2 == 0) else 1
    return int(tile), int(num_tiles), int(num_splits), int(num_tiles // num_splits)


def _weighted_ce_kernel(x_ref, t_ref, w_ref, loss_ref, div_ref, *,
                        hw, tile_p, tiles_per_split):
    # x_ref:    (C, TP)  logits tile (f32 or bf16; upcast here)
    # t_ref:    (1, TP)  original labels in [0, C]  (0 == ignore)
    # w_ref:    (C, 1)   f32 class weights (weight[c-1] for original label c)
    # loss_ref: (1, TP)  f32 lane-wise partial loss accumulator (per (image, split))
    # div_ref:  (1, TP)  f32 lane-wise partial divisor accumulator
    s = pl.program_id(1)
    i = pl.program_id(2)

    @pl.when(i == 0)
    def _():
        loss_ref[...] = jnp.zeros_like(loss_ref)
        div_ref[...] = jnp.zeros_like(div_ref)

    x = x_ref[...].astype(jnp.float32)                         # (C, TP) f32 math
    t = t_ref[...].astype(jnp.int32)                           # (1, TP)
    w = w_ref[...]                                             # (C, 1)
    tm = t - 1                                                 # -1 marks ignored pixels

    # numerically-stable log-sum-exp over the class (sublane) axis
    m = jnp.max(x, axis=0, keepdims=True)                      # (1, TP)
    z = x - m                                                  # (C, TP)
    lse = jnp.log(jnp.sum(jnp.exp(z), axis=0, keepdims=True))  # (1, TP)

    # masked gathers instead of materializing the full log-softmax
    # TODO(synk): the class iota / weight lane-splat are regenerated every grid
    # step; they could be hoisted into VMEM scratch (or w_pix computed as a
    # one-hot MXU matmul) once the kernel stops being DMA-bound.
    cls = jax.lax.broadcasted_iota(jnp.int32, x.shape, 0)      # (C, TP)
    is_tgt = cls == tm                                         # all-False col if ignored
    w_pix = jnp.sum(jnp.where(is_tgt, w, 0.0),
                    axis=0, keepdims=True)                     # (1, TP) weight[target] or 0
    z_tgt = jnp.sum(jnp.where(is_tgt, z, 0.0),
                    axis=0, keepdims=True)                     # (1, TP) z[target] or 0

    # Ragged-tail mask: the last tile may extend past HW; its lanes can contain
    # arbitrary garbage (possibly Inf/NaN), so select explicitly instead of
    # relying on multiplication by zero.
    start = (s * tiles_per_split + i) * tile_p
    lane = jax.lax.broadcasted_iota(jnp.int32, (1, tile_p), 1)
    valid = (start + lane) < hw

    # per-pixel weighted NLL = w_pix * (lse - z[target]); ignored pixels give 0
    loss_ref[...] += jnp.where(valid, w_pix * (lse - z_tgt), 0.0)
    div_ref[...] += jnp.where(valid, w_pix, 0.0)


def _reference_loss(logits_nchw, targets_nhw, weight):
    """Pure-JAX implementation (also used as the fallback for tiny scales)."""
    tm = targets_nhw.astype(jnp.int32) - 1
    logp = jax.nn.log_softmax(logits_nchw.astype(jnp.float32), axis=1)   # (N, C, H, W)
    valid = (tm >= 0).astype(jnp.float32)
    tclamp = jnp.clip(tm, 0, None)
    gathered = jnp.take_along_axis(logp, tclamp[:, None], axis=1)[:, 0]  # (N, H, W)
    wpix = weight[tclamp] * valid
    return jnp.sum(-gathered * wpix) / jnp.sum(wpix)


@partial(jax.jit, static_argnames=("max_tile_p",))
def weighted_ce_loss_single(logits_nchw, targets_nhw, weight, *, max_tile_p=None):
    """One scale: logits (N, C, H, W) f32/bf16, targets (N, H, W) int in [0, C]."""
    n, c, h, wd = logits_nchw.shape
    hw = h * wd
    weight = jnp.asarray(weight, jnp.float32)

    # Tiny scales are pure launch/per-step overhead for Pallas -> fused XLA path.
    if hw < _PALLAS_MIN_PIXELS:
        return _reference_loss(logits_nchw, targets_nhw, weight)

    # Free views — no transpose, no pad, no extra HBM pass over the logits.
    x = logits_nchw.reshape(n, c, hw)
    t = targets_nhw.reshape(n, 1, hw)
    # Keep small integer label dtypes (uint8/int16) as-is: the kernel upcasts
    # after the load, so narrow label maps save HBM bandwidth automatically.
    if (not jnp.issubdtype(t.dtype, jnp.integer)) or jnp.dtype(t.dtype).itemsize > 4:
        t = t.astype(jnp.int32)

    vmem_limit = _vmem_limit_bytes()
    tile_p, num_tiles, num_splits, tiles_per_split = _plan_tiles(
        c, hw, x.dtype, t.dtype, vmem_limit, max_tile_p)

    wcol = weight.reshape(c, 1)
    kernel = partial(_weighted_ce_kernel, hw=hw, tile_p=tile_p,
                     tiles_per_split=tiles_per_split)

    loss_part, div_part = pl.pallas_call(
        kernel,
        out_shape=(jax.ShapeDtypeStruct((n, num_splits, 1, tile_p), jnp.float32),
                   jax.ShapeDtypeStruct((n, num_splits, 1, tile_p), jnp.float32)),
        grid_spec=pltpu.PrefetchScalarGridSpec(
            num_scalar_prefetch=0,
            grid=(n, num_splits, tiles_per_split),       # reduction axis last
            in_specs=[
                pl.BlockSpec((None, c, tile_p),
                             lambda b, s, i: (b, 0, s * tiles_per_split + i)),
                pl.BlockSpec((None, 1, tile_p),
                             lambda b, s, i: (b, 0, s * tiles_per_split + i)),
                pl.BlockSpec((c, 1), lambda b, s, i: (0, 0)),
            ],
            out_specs=[
                pl.BlockSpec((None, None, 1, tile_p), lambda b, s, i: (b, s, 0, 0)),
                pl.BlockSpec((None, None, 1, tile_p), lambda b, s, i: (b, s, 0, 0)),
            ],
        ),
        compiler_params=pltpu.CompilerParams(
            dimension_semantics=("parallel", "parallel", "arbitrary"),
            vmem_limit_bytes=vmem_limit,
        ),
    )(x, t, wcol)

    # Final cross-lane reduction + divide, once per scale, in plain JAX.
    # NOTE: a scale with zero valid pixels yields NaN (0/0) — same as PyTorch.
    return jnp.sum(loss_part) / jnp.sum(div_part)


class CrossEntropyLoss2d:
    """JAX/Pallas equivalent of the PyTorch CrossEntropyLoss2d module."""

    def __init__(self, weight):
        self.weight = jnp.asarray(weight, jnp.float32)
        self.num_classes = len(weight) + 1
        # torch's uint8/int16 bincount is only an internal optimization; the divisor
        # here is an equivalent weighted sum over valid pixels, so no bincount needed.

    def __call__(self, inputs_scales, targets_scales):
        # TODO(synk): the per-scale pallas_calls could be fused into one kernel by
        # concatenating flattened pixel streams; kept per-scale (jit'ed) for clarity.
        return [
            weighted_ce_loss_single(inp, tgt, self.weight)
            for inp, tgt in zip(inputs_scales, targets_scales)
        ]


if __name__ == "__main__":
    key = jax.random.PRNGKey(0)
    # deterministic "module parameter": class weights for 4 foreground classes
    weight = jnp.array([1.0, 2.0, 0.5, 1.5], dtype=jnp.float32)
    C = int(weight.shape[0])                # logits channels
    num_classes = C + 1                     # labels in [0, C], 0 == void/ignore

    k1, k2, k3, k4, k5, k6 = jax.random.split(key, 6)
    # three scales, NCHW logits + integer label maps
    inputs_scales = [
        jax.random.normal(k1, (2, C, 40, 41), dtype=jnp.float32),  # 1640 px: ragged tail
        jax.random.normal(k2, (2, C, 48, 48), dtype=jnp.float32),  # 2304 px: exact tile
        jax.random.normal(k3, (2, C, 16, 16), dtype=jnp.float32),  # tiny: dense fallback
    ]
    targets_scales = [
        jax.random.randint(k4, (2, 40, 41), 0, num_classes, dtype=jnp.int32),
        jax.random.randint(k5, (2, 48, 48), 0, num_classes, dtype=jnp.int32),
        jax.random.randint(k6, (2, 16, 16), 0, num_classes, dtype=jnp.int32),
    ]

    loss_fn = CrossEntropyLoss2d(weight)
    losses = loss_fn(inputs_scales, targets_scales)
    losses = [jax.block_until_ready(l) for l in losses]

    # validate against the pure-JAX reference (f32 path)
    for inp, tgt, got in zip(inputs_scales, targets_scales, losses):
        ref = _reference_loss(inp, tgt, weight)
        assert jnp.allclose(got, ref, rtol=1e-4, atol=1e-5), (got, ref)

    # force the multi-tile / two-split / tail-mask / accumulation path explicitly
    got_tiled = weighted_ce_loss_single(
        inputs_scales[0], targets_scales[0], weight, max_tile_p=512)
    got_tiled = jax.block_until_ready(got_tiled)
    ref0 = _reference_loss(inputs_scales[0], targets_scales[0], weight)
    assert jnp.allclose(got_tiled, ref0, rtol=1e-4, atol=1e-5), (got_tiled, ref0)

    # bf16 logits path: halved HBM traffic, in-kernel math stays f32
    bf16_inputs = [x.astype(jnp.bfloat16) for x in inputs_scales]
    losses_bf16 = loss_fn(bf16_inputs, targets_scales)
    losses_bf16 = [jax.block_until_ready(l) for l in losses_bf16]
    for inp, tgt, got in zip(bf16_inputs, targets_scales, losses_bf16):
        ref = _reference_loss(inp.astype(jnp.float32), tgt, weight)
        assert jnp.allclose(got, ref, rtol=1e-4, atol=1e-4), (got, ref)

    print("KERNEL_OK")
</pallas_src>

<mosaic_0001>
module attributes {stable_mosaic.version = 11 : i64} {
  func.func @_weighted_ce_kernel(%arg0: i32, %arg1: i32, %arg2: i32, %arg3: memref<1x4x1664xf32, #tpu.memory_space<vmem>>, %arg4: memref<1x1x1664xi32, #tpu.memory_space<vmem>>, %arg5: memref<4x1xf32, #tpu.memory_space<vmem>>, %arg6: memref<1x1x1x1664xf32, #tpu.memory_space<vmem>>, %arg7: memref<1x1x1x1664xf32, #tpu.memory_space<vmem>>) attributes {dimension_semantics = [#tpu.dimension_semantics<parallel>, #tpu.dimension_semantics<parallel>, #tpu.dimension_semantics<arbitrary>], iteration_bounds = array<i64: 2, 1, 1>, scalar_prefetch = 0 : i64, scratch_operands = 0 : i64, tpu.core_type = #tpu.core_type<tc>, window_params = [{transform_indices = @transform_0, window_bounds = array<i64: 1, 4, 1664>}, {transform_indices = @transform_1, window_bounds = array<i64: 1, 1, 1664>}, {pipeline_mode = #tpu.pipeline_mode<synchronous>, transform_indices = @transform_2, window_bounds = array<i64: 4, 1>}, {transform_indices = @transform_3, window_bounds = array<i64: 1, 1, 1, 1664>}, {transform_indices = @transform_4, window_bounds = array<i64: 1, 1, 1, 1664>}]} {
    %c0_i32 = arith.constant 0 : i32
    %0 = arith.cmpi eq, %arg2, %c0_i32 : i32
    %1 = arith.extui %0 : i1 to i32
    %c0_i32_0 = arith.constant 0 : i32
    %2 = arith.cmpi ne, %1, %c0_i32_0 : i32
    scf.if %2 {
      %cst_32 = arith.constant 0.000000e+00 : f32
      %57 = vector.broadcast %cst_32 : f32 to vector<1x1664xf32>
      %c0_33 = arith.constant 0 : index
      %c0_34 = arith.constant 0 : index
      %c0_35 = arith.constant 0 : index
      %c0_36 = arith.constant 0 : index
      %58 = vector.load %arg6[%c0_33, %c0_34, %c0_35, %c0_36] : memref<1x1x1x1664xf32, #tpu.memory_space<vmem>>, vector<1x1x1x1664xf32>
      %59 = vector.shape_cast %58 : vector<1x1x1x1664xf32> to vector<1x1664xf32>
      %60 = vector.shape_cast %57 : vector<1x1664xf32> to vector<1x1x1x1664xf32>
      tpu.vector_store %arg6[%c0_33, %c0_34, %c0_35, %c0_36], %60 {strides = array<i32>} : memref<1x1x1x1664xf32, #tpu.memory_space<vmem>>, vector<1x1x1x1664xf32>,
      %cst_37 = arith.constant 0.000000e+00 : f32
      %61 = vector.broadcast %cst_37 : f32 to vector<1x1664xf32>
      %c0_38 = arith.constant 0 : index
      %c0_39 = arith.constant 0 : index
      %c0_40 = arith.constant 0 : index
      %c0_41 = arith.constant 0 : index
      %62 = vector.load %arg7[%c0_38, %c0_39, %c0_40, %c0_41] : memref<1x1x1x1664xf32, #tpu.memory_space<vmem>>, vector<1x1x1x1664xf32>
      %63 = vector.shape_cast %62 : vector<1x1x1x1664xf32> to vector<1x1664xf32>
      %64 = vector.shape_cast %61 : vector<1x1664xf32> to vector<1x1x1x1664xf32>
      tpu.vector_store %arg7[%c0_38, %c0_39, %c0_40, %c0_41], %64 {strides = array<i32>} : memref<1x1x1x1664xf32, #tpu.memory_space<vmem>>, vector<1x1x1x1664xf32>,
    } else {
    }
    %c0 = arith.constant 0 : index
    %c0_1 = arith.constant 0 : index
    %c0_2 = arith.constant 0 : index
    %3 = vector.load %arg3[%c0, %c0_1, %c0_2] : memref<1x4x1664xf32, #tpu.memory_space<vmem>>, vector<1x4x1664xf32>
    %4 = vector.shape_cast %3 : vector<1x4x1664xf32> to vector<4x1664xf32>
    %c0_3 = arith.constant 0 : index
    %c0_4 = arith.constant 0 : index
    %c0_5 = arith.constant 0 : index
    %5 = vector.load %arg4[%c0_3, %c0_4, %c0_5] : memref<1x1x1664xi32, #tpu.memory_space<vmem>>, vector<1x1x1664xi32>
    %6 = vector.shape_cast %5 : vector<1x1x1664xi32> to vector<1x1664xi32>
    %c0_6 = arith.constant 0 : index
    %c0_7 = arith.constant 0 : index
    %7 = vector.load %arg5[%c0_6, %c0_7] : memref<4x1xf32, #tpu.memory_space<vmem>>, vector<4x1xf32>
    %c1_i32 = arith.constant 1 : i32
    %8 = vector.broadcast %c1_i32 : i32 to vector<1x1664xi32>
    %9 = arith.subi %6, %8 : vector<1x1664xi32>
    %cst = arith.constant dense<0xFF800000> : vector<1664xf32>
    %10 = vector.multi_reduction <maximumf>, %4, %cst [0] : vector<4x1664xf32> to vector<1664xf32>
    %11 = vector.shape_cast %10 : vector<1664xf32> to vector<1x1664xf32>
    %12 = vector.broadcast %11 : vector<1x1664xf32> to vector<4x1664xf32>
    %13 = arith.subf %4, %12 : vector<4x1664xf32>
    %14 = math.exp %13 : vector<4x1664xf32>
    %cst_8 = arith.constant dense<0.000000e+00> : vector<1664xf32>
    %15 = vector.multi_reduction <add>, %14, %cst_8 [0] : vector<4x1664xf32> to vector<1664xf32>
    %16 = vector.shape_cast %15 : vector<1664xf32> to vector<1x1664xf32>
    %17 = math.log %16 : vector<1x1664xf32>
    %18 = tpu.iota {dimensions = array<i32: 0>} : vector<4x1664xi32>
    %19 = vector.broadcast %9 : vector<1x1664xi32> to vector<4x1664xi32>
    %20 = arith.cmpi eq, %18, %19 : vector<4x1664xi32>
    %cst_9 = arith.constant 0.000000e+00 : f32
    %21 = vector.shape_cast %7 : vector<4x1xf32> to vector<4x1xf32>
    %22 = vector.broadcast %21 : vector<4x1xf32> to vector<4x1664xf32>
    %23 = vector.broadcast %cst_9 : f32 to vector<4x1664xf32>
    %24 = arith.select %20, %22, %23 : vector<4x1664xi1>, vector<4x1664xf32>
    %cst_10 = arith.constant dense<0.000000e+00> : vector<1664xf32>
    %25 = vector.multi_reduction <add>, %24, %cst_10 [0] : vector<4x1664xf32> to vector<1664xf32>
    %26 = vector.shape_cast %25 : vector<1664xf32> to vector<1x1664xf32>
    %cst_11 = arith.constant 0.000000e+00 : f32
    %27 = vector.broadcast %cst_11 : f32 to vector<4x1664xf32>
    %28 = arith.select %20, %13, %27 : vector<4x1664xi1>, vector<4x1664xf32>
    %cst_12 = arith.constant dense<0.000000e+00> : vector<1664xf32>
    %29 = vector.multi_reduction <add>, %28, %cst_12 [0] : vector<4x1664xf32> to vector<1664xf32>
    %30 = vector.shape_cast %29 : vector<1664xf32> to vector<1x1664xf32>
    %c1_i32_13 = arith.constant 1 : i32
    %31 = arith.muli %arg1, %c1_i32_13 : i32
    %32 = arith.addi %31, %arg2 : i32
    %c1664_i32 = arith.constant 1664 : i32
    %33 = arith.muli %32, %c1664_i32 : i32
    %34 = tpu.iota {dimensions = array<i32: 1>} : vector<1x1664xi32>
    %35 = vector.broadcast %33 : i32 to vector<1x1664xi32>
    %36 = arith.addi %35, %34 : vector<1x1664xi32>
    %c1640_i32 = arith.constant 1640 : i32
    %37 = vector.broadcast %c1640_i32 : i32 to vector<1x1664xi32>
    %38 = arith.cmpi slt, %36, %37 : vector<1x1664xi32>
    %c0_14 = arith.constant 0 : index
    %c0_15 = arith.constant 0 : index
    %c0_16 = arith.constant 0 : index
    %c0_17 = arith.constant 0 : index
    %39 = vector.load %arg6[%c0_14, %c0_15, %c0_16, %c0_17] : memref<1x1x1x1664xf32, #tpu.memory_space<vmem>>, vector<1x1x1x1664xf32>
    %40 = vector.shape_cast %39 : vector<1x1x1x1664xf32> to vector<1x1664xf32>
    %41 = arith.subf %17, %30 : vector<1x1664xf32>
    %42 = arith.mulf %26, %41 : vector<1x1664xf32>
    %cst_18 = arith.constant 0.000000e+00 : f32
    %43 = vector.broadcast %cst_18 : f32 to vector<1x1664xf32>
    %44 = arith.select %38, %42, %43 : vector<1x1664xi1>, vector<1x1664xf32>
    %45 = arith.addf %40, %44 : vector<1x1664xf32>
    %c0_19 = arith.constant 0 : index
    %c0_20 = arith.constant 0 : index
    %c0_21 = arith.constant 0 : index
    %c0_22 = arith.constant 0 : index
    %46 = vector.load %arg6[%c0_19, %c0_20, %c0_21, %c0_22] : memref<1x1x1x1664xf32, #tpu.memory_space<vmem>>, vector<1x1x1x1664xf32>
    %47 = vector.shape_cast %46 : vector<1x1x1x1664xf32> to vector<1x1664xf32>
    %48 = vector.shape_cast %45 : vector<1x1664xf32> to vector<1x1x1x1664xf32>
    tpu.vector_store %arg6[%c0_19, %c0_20, %c0_21, %c0_22], %48 {strides = array<i32>} : memref<1x1x1x1664xf32, #tpu.memory_space<vmem>>, vector<1x1x1x1664xf32>,
    %c0_23 = arith.constant 0 : index
    %c0_24 = arith.constant 0 : index
    %c0_25 = arith.constant 0 : index
    %c0_26 = arith.constant 0 : index
    %49 = vector.load %arg7[%c0_23, %c0_24, %c0_25, %c0_26] : memref<1x1x1x1664xf32, #tpu.memory_space<vmem>>, vector<1x1x1x1664xf32>
    %50 = vector.shape_cast %49 : vector<1x1x1x1664xf32> to vector<1x1664xf32>
    %cst_27 = arith.constant 0.000000e+00 : f32
    %51 = vector.broadcast %cst_27 : f32 to vector<1x1664xf32>
    %52 = arith.select %38, %26, %51 : vector<1x1664xi1>, vector<1x1664xf32>
    %53 = arith.addf %50, %52 : vector<1x1664xf32>
    %c0_28 = arith.constant 0 : index
    %c0_29 = arith.constant 0 : index
    %c0_30 = arith.constant 0 : index
    %c0_31 = arith.constant 0 : index
    %54 = vector.load %arg7[%c0_28, %c0_29, %c0_30, %c0_31] : memref<1x1x1x1664xf32, #tpu.memory_space<vmem>>, vector<1x1x1x1664xf32>
    %55 = vector.shape_cast %54 : vector<1x1x1x1664xf32> to vector<1x1664xf32>
    %56 = vector.shape_cast %53 : vector<1x1664xf32> to vector<1x1x1x1664xf32>
    tpu.vector_store %arg7[%c0_28, %c0_29, %c0_30, %c0_31], %56 {strides = array<i32>} : memref<1x1x1x1664xf32, #tpu.memory_space<vmem>>, vector<1x1x1x1664xf32>,
    return
  }
  func.func @transform_0(%arg0: i32, %arg1: i32, %arg2: i32) -> (i32, i32, i32) {
    %c1_i32 = arith.constant 1 : i32
    %0 = arith.muli %arg1, %c1_i32 : i32
    %1 = arith.addi %0, %arg2 : i32
    %c0_i32 = arith.constant 0 : i32
    %c0_i32_0 = arith.constant 0 : i32
    return %arg0, %c0_i32, %1 : i32, i32, i32
  }
  func.func @transform_1(%arg0: i32, %arg1: i32, %arg2: i32) -> (i32, i32, i32) {
    %c1_i32 = arith.constant 1 : i32
    %0 = arith.muli %arg1, %c1_i32 : i32
    %1 = arith.addi %0, %arg2 : i32
    %c0_i32 = arith.constant 0 : i32
    %c0_i32_0 = arith.constant 0 : i32
    return %arg0, %c0_i32, %1 : i32, i32, i32
  }
  func.func @transform_2(%arg0: i32, %arg1: i32, %arg2: i32) -> (i32, i32) {
    %c0_i32 = arith.constant 0 : i32
    %c0_i32_0 = arith.constant 0 : i32
    %c0_i32_1 = arith.constant 0 : i32
    return %c0_i32, %c0_i32_0 : i32, i32
  }
  func.func @transform_3(%arg0: i32, %arg1: i32, %arg2: i32) -> (i32, i32, i32, i32) {
    %c0_i32 = arith.constant 0 : i32
    %c0_i32_0 = arith.constant 0 : i32
    %c0_i32_1 = arith.constant 0 : i32
    return %arg0, %arg1, %c0_i32, %c0_i32_0 : i32, i32, i32, i32
  }
  func.func @transform_4(%arg0: i32, %arg1: i32, %arg2: i32) -> (i32, i32, i32, i32) {
    %c0_i32 = arith.constant 0 : i32
    %c0_i32_0 = arith.constant 0 : i32
    %c0_i32_1 = arith.constant 0 : i32
    return %arg0, %arg1, %c0_i32, %c0_i32_0 : i32, i32, i32, i32
  }
}

</mosaic_0001>

<bundles_post_ra>
// kernel: weighted_ce_loss_single.1
= control target key start
LH: loop header
LB: loop body
LE: loop exit
PB: predicated region body
PF: predicated region fallthrough
CT: control target
= control target key end

     0   :  { %s1524_s15 = smov 0   ;;  %s1526_s16 = smov 0   ;;  %s2095_s0 = inlined_call_operand.vmem [shape: f32[2,4,1640], index: 0, kind: input, shape index: {}]   ;;  %s2096_s1 = inlined_call_operand.vmem [shape: s32[2,1,1640], index: 1, kind: input, shape index: {}]   ;;  %s2097_s2 = inlined_call_operand.vmem [shape: f32[4,1], index: 2, kind: input, shape index: {}]   ;;  %s2098_s3 = inlined_call_operand.vmem [shape: f32[2,1,1,1664], index: 3, kind: output, shape index: {0}]   ;;  %s2099_s4 = inlined_call_operand.vmem [shape: f32[2,1,1,1664], index: 4, kind: output, shape index: {1}]  }
   0x1   :  { %s1528_s17 = smov 0  }
   0x2 LB: > { %s34_s18 = sadd.s32 1, %s1490_s16  ;;  %p1390_p0 = scmp.ge.s32.totalorder %s1494_s17, 1  ;;  %s1494_s17 = sphi %s1528_s17, %s15_s17   ;;  %s1490_s16 = sphi %s1526_s16, %s2131_s16   ;;  %s1486_s15 = sphi %s1524_s15, %s2130_s15  }
   0x3   : > { %p36_p1 = scmp.ge.s32.totalorder %s34_s18, 2  ;;  %p219_p2 = scmp.lt.s32.totalorder %s1494_s17, 3 }
   0x5   : > { %s2133_s18 = smov (%p36_p1, %s34_s18), 0  ;;  %p220_p3 = pnand %p1390_p0, %p219_p2 }
   0x7   : > { %223 = sbr.rel (%p220_p3) target bundleno = 196 (0xc4), region = 32 }
   0xe   : > { %v330_v0 = vld [vmem:[%s2097_s2] sm:$0xf]  ;;  %p272_p4 = scmp.lt.s32.totalorder %s1486_s15, 1  ;;  %v1496_v1 = vmov 0   ;;  %v2100_v2 = vlaneseq  ;;  %vm351_vm0 = vcmask 1043456   ;;  %v2106_v3 = vmov 0 }
   0xf   : > { %1425 = vset.pattern.permute.xlu0 %v1496_v1  ;;  %v1497_v7 = vmov 0.0  }
  0x10   : > { %692 = vperm.xlu0 %1425, %v330_v0   ;;  %s2135_s15 = smov (!%p272_p4, %s1486_s15), 1  ;;  %vm1553_vm1 = vcmp.lt.s32.totalorder %v2100_v2, 640  ;;  %v1604_v17 = vshrl.u32 %v2100_v2, 7 }
  0x11   : > { %s1396_s21 = smul.u32 52, %s2135_s15  ;;  %v2107_v3 = vsel %vm1553_vm1, 4294967295, %v2106_v3 }
  0x12   : > { %s1545_s22 = smul.u32 13, %s2135_s15  ;;  %2108 = vst [vmem:[#allocation2_spill] sm:$0xff] %v2107_v3 }
  0x13   : > { %s1550_s25 = scalar_lea.vmem %s2095_s0, %s1396_s21 }
  0x14   : > { %s1561_s28 = scalar_lea.vmem %s2098_s3, %s1545_s22  ;;  %v1564_v4 = vld [vmem:[%s1550_s25] sm:$0xff]  ;;  %v1567_v5 = vld [vmem:[%s1550_s25 + $0x8] sm:$0xff]  ;;  %v1570_v6 = vld [vmem:[%s1550_s25 + $0x10] sm:$0xff]  ;;  %s1576_s5 = scalar_lea.vmem %s2099_s4, %s1545_s22 }
  0x15   : > { %318 = vst.msk [vmem:[%s1561_s28 + $0x8] sm:$0x1f] %vm1553_vm1, %v1497_v7  ;;  %v1582_v8 = vld [vmem:[%s1550_s25 + $0x18] sm:$0xff]  ;;  %v1585_v9 = vld [vmem:[%s1550_s25 + $0x20] sm:$0xff]  ;;  %v1588_v10 = vld [vmem:[%s1550_s25 + $0x28] sm:$0xff]  ;;  %v339_v11 = vcombine.high %v1564_v4, %v1564_v4  ;;  %v340_v12 = vcombine.high %v1567_v5, %v1567_v5  ;;  %v341_v13 = vcombine.high %v1570_v6, %v1570_v6  ;;  %v352_v14 = vsel %vm351_vm0, %v1564_v4, -inf  ;;  %s290_s8 = scalar_lea.vmem %s2096_s1, %s1545_s22 }
  0x16   : > { %320 = vst.msk [vmem:[%s1576_s5 + $0x8] sm:$0x1f] %vm1553_vm1, %v1497_v7  ;;  %v342_v15 = vcombine.high %v1582_v8, %v1582_v8  ;;  %v353_v16 = vrot.slane %v352_v14, 4  ;;  %v343_v18 = vcombine.high %v1585_v9, %v1585_v9  ;;  %v344_v19 = vcombine.high %v1588_v10, %v1588_v10  ;;  %v1623_v7 = vld [vmem:[%s1550_s25 + $0x30] sm:$0xf] }
  0x17   : > { %v359_v20 = vsel %vm351_vm0, %v339_v11, -inf  ;;  %v366_v21 = vsel %vm351_vm0, %v1567_v5, -inf  ;;  %v373_v25 = vsel %vm351_vm0, %v340_v12, -inf  ;;  %v380_v27 = vsel %vm351_vm0, %v1570_v6, -inf }
  0x18   : > { %v354_v22 = vmax.f32 %v352_v14, %v353_v16  ;;  %v360_v23 = vrot.slane %v359_v20, 4  ;;  %v367_v24 = vrot.slane %v366_v21, 4  ;;  %v374_v26 = vrot.slane %v373_v25, 4 }
  0x19   : > { %v387_v28 = vsel %vm351_vm0, %v341_v13, -inf  ;;  %v394_v29 = vsel %vm351_vm0, %v1582_v8, -inf  ;;  %v381_v33 = vrot.slane %v380_v27, 4  ;;  %v401_v37 = vsel %vm351_vm0, %v342_v15, -inf }
  0x1a   : > { %v355_v30 = vrot.slane %v354_v22, 2  ;;  %v361_v31 = vmax.f32 %v359_v20, %v360_v23  ;;  %v368_v32 = vmax.f32 %v366_v21, %v367_v24  ;;  %v375_v34 = vmax.f32 %v373_v25, %v374_v26 }
  0x1b   : > { %v388_v35 = vrot.slane %v387_v28, 4  ;;  %v395_v36 = vrot.slane %v394_v29, 4  ;;  %v382_v41 = vmax.f32 %v380_v27, %v381_v33  ;;  %v402_v45 = vrot.slane %v401_v37, 4 }
  0x1c   : > { %v356_v38 = vmax.f32 %v354_v22, %v355_v30  ;;  %v362_v39 = vrot.slane %v361_v31, 2  ;;  %v369_v40 = vrot.slane %v368_v32, 2  ;;  %v376_v42 = vrot.slane %v375_v34, 2 }
  0x1d   : > { %v389_v43 = vmax.f32 %v387_v28, %v388_v35  ;;  %v396_v44 = vmax.f32 %v394_v29, %v395_v36  ;;  %v383_v49 = vrot.slane %v382_v41, 2  ;;  %v403_v53 = vmax.f32 %v401_v37, %v402_v45 }
  0x1e   : > { %v357_v46 = vrot.slane %v356_v38, 1  ;;  %v363_v47 = vmax.f32 %v361_v31, %v362_v39  ;;  %v370_v48 = vmax.f32 %v368_v32, %v369_v40  ;;  %v377_v50 = vmax.f32 %v375_v34, %v376_v42 }
  0x1f   : > { %v390_v51 = vrot.slane %v389_v43, 2  ;;  %v397_v52 = vrot.slane %v396_v44, 2  ;;  %v384_v57 = vmax.f32 %v382_v41, %v383_v49  ;;  %v404_v61 = vrot.slane %v403_v53, 2 }
  0x20   : > { %v358_v54 = vmax.f32 %v356_v38, %v357_v46  ;;  %v364_v55 = vrot.slane %v363_v47, 1  ;;  %v371_v56 = vrot.slane %v370_v48, 1  ;;  %v378_v58 = vrot.slane %v377_v50, 1 }
  0x21   : > { %v391_v59 = vmax.f32 %v389_v43, %v390_v51  ;;  %v398_v60 = vmax.f32 %v396_v44, %v397_v52  ;;  %v385_v0 = vrot.slane %v384_v57, 1  ;;  %v408_v1 = vsel %vm351_vm0, %v1585_v9, -inf }
  0x22   : > { %v365_v62 = vmax.f32 %v363_v47, %v364_v55  ;;  %v372_v63 = vmax.f32 %v370_v48, %v371_v56  ;;  %v379_v11 = vmax.f32 %v377_v50, %v378_v58  ;;  %v405_v14 = vmax.f32 %v403_v53, %v404_v61  ;;  %v328_v58 = vld [vmem:[%s290_s8] sm:$0xff] }
  0x23   : > { %v392_v12 = vrot.slane %v391_v59, 1  ;;  %v399_v13 = vrot.slane %v398_v60, 1  ;;  %v386_v15 = vmax.f32 %v384_v57, %v385_v0  ;;  %v409_v16 = vrot.slane %v408_v1, 4 }
  0x24   : > { %v415_v20 = vsel %vm351_vm0, %v343_v18, -inf  ;;  %v422_v21 = vsel %vm351_vm0, %v1588_v10, -inf  ;;  %v406_v24 = vrot.slane %v405_v14, 1  ;;  %v429_v28 = vsel %vm351_vm0, %v344_v19, -inf }
  0x25   : > { %v393_v22 = vmax.f32 %v391_v59, %v392_v12  ;;  %v400_v23 = vmax.f32 %v398_v60, %v399_v13  ;;  %v416_v25 = vrot.slane %v415_v20, 4  ;;  %v410_v26 = vmax.f32 %v408_v1, %v409_v16  ;;  %v329_v1 = vld [vmem:[%s290_s8 + $0x8] sm:$0x1f] }
  0x26   : > { %v423_v27 = vrot.slane %v422_v21, 4  ;;  %v436_v29 = vsel %vm351_vm0, %v1623_v7, -inf  ;;  %v407_v30 = vmax.f32 %v405_v14, %v406_v24  ;;  %v430_v32 = vrot.slane %v429_v28, 4 }
  0x27   : > { %v417_v31 = vmax.f32 %v415_v20, %v416_v25  ;;  %v437_v33 = vrot.slane %v436_v29, 4  ;;  %v411_v34 = vrot.slane %v410_v26, 2  ;;  %v455_v35 = vcombine.low %v358_v54, %v365_v62 }
  0x28   : > { %v424_v18 = vmax.f32 %v422_v21, %v423_v27  ;;  %v456_v36 = vcombine.low %v372_v63, %v379_v11  ;;  %v431_v38 = vmax.f32 %v429_v28, %v430_v32  ;;  %v457_v40 = vcombine.low %v386_v15, %v393_v22 }
  0x29   : > { %v418_v37 = vrot.slane %v417_v31, 2  ;;  %v438_v39 = vmax.f32 %v436_v29, %v437_v33  ;;  %v412_v41 = vmax.f32 %v410_v26, %v411_v34  ;;  %v458_v43 = vcombine.low %v400_v23, %v407_v30 }
  0x2a   : > { %v425_v42 = vrot.slane %v424_v18, 2  ;;  %v1632_v19 = vsub.f32 %v1564_v4, %v455_v35  ;;  %v432_v45 = vrot.slane %v431_v38, 2  ;;  %v1635_v47 = vsub.f32 %v1567_v5, %v456_v36 }
  0x2b   : > { %v419_v44 = vmax.f32 %v417_v31, %v418_v37  ;;  %v439_v46 = vrot.slane %v438_v39, 2  ;;  %v413_v48 = vrot.slane %v412_v41, 1  ;;  %v1642_v50 = vsub.f32 %v1570_v6, %v457_v40 }
  0x2c   : > { %v426_v49 = vmax.f32 %v424_v18, %v425_v42  ;;  %v1645_v51 = vsub.f32 %v1582_v8, %v458_v43  ;;  %v433_v52 = vmax.f32 %v431_v38, %v432_v45  ;;  %v474_v54 = vmul.f32 1.442695, %v1632_v19 }
  0x2d   : > { %v420_v4 = vrot.slane %v419_v44, 1  ;;  %v440_v53 = vmax.f32 %v438_v39, %v439_v46  ;;  %v414_v55 = vmax.f32 %v412_v41, %v413_v48  ;;  %v476_v56 = vmul.f32 1.442695, %v1635_v47 }
  0x2e   : > { %v427_v5 = vrot.slane %v426_v49, 1  ;;  %v478_v57 = vmul.f32 1.442695, %v1642_v50  ;;  %v434_v60 = vrot.slane %v433_v52, 1  ;;  %1432 = vpow2.f32 %v474_v54 }
  0x2f   : > { %v421_v59 = vmax.f32 %v419_v44, %v420_v4  ;;  %v441_v61 = vrot.slane %v440_v53, 1  ;;  %1434 = vpow2.f32 %v476_v56  ;;  %v480_v8 = vmul.f32 1.442695, %v1645_v51 }
  0x30   : > { %v428_v6 = vmax.f32 %v426_v49, %v427_v5  ;;  %v435_v62 = vmax.f32 %v433_v52, %v434_v60  ;;  %1436 = vpow2.f32 %v478_v57  ;;  %v1392_v11 = vadd.s32 4294967295, %v328_v58 }
  0x31   : > { %v442_v63 = vmax.f32 %v440_v53, %v441_v61  ;;  %v459_v0 = vcombine.low %v414_v55, %v421_v59  ;;  %1438 = vpow2.f32 %v480_v8  ;;  %v627_v12 = vsub.s32 0, %v1604_v17 }
  0x32   : > { %v631_v13 = vsub.s32 1, %v1604_v17  ;;  %v460_v14 = vcombine.low %v428_v6, %v435_v62  ;;  %v635_v20 = vsub.s32 2, %v1604_v17  ;;  %v639_v21 = vsub.s32 3, %v1604_v17 }
  0x33   : > { %v1654_v15 = vsub.f32 %v1585_v9, %v459_v0  ;;  %v1657_v16 = vsub.f32 %v1623_v7, %v442_v63  ;;  %v643_v22 = vsub.s32 4, %v1604_v17  ;;  %v647_v23 = vsub.s32 5, %v1604_v17 }
  0x34   : > { %v651_v24 = vsub.s32 6, %v1604_v17  ;;  %v1664_v25 = vadd.s32 4294967295, %v329_v1  ;;  %v1667_v26 = vsub.f32 %v1588_v10, %v460_v14  ;;  %v655_v7 = vsub.s32 7, %v1604_v17 }
  0x35   : > { %v482_v9 = vmul.f32 1.442695, %v1654_v15  ;;  %v1671_v27 = vrot.slane %v1392_v11, %v627_v12  ;;  %v486_v29 = vmul.f32 1.442695, %v1657_v16  ;;  %v1675_v30 = vrot.slane %v1392_v11, %v631_v13 }
  0x36   : > { %v484_v28 = vmul.f32 1.442695, %v1667_v26  ;;  %v1677_v31 = vrot.slane %v1392_v11, %v635_v20  ;;  %v1679_v32 = vrot.slane %v1392_v11, %v639_v21  ;;  %v1683_v10 = vrot.slane %v1392_v11, %v643_v22 }
  0x37   : > { %1440 = vpow2.f32 %v482_v9  ;;  %v1685_v33 = vrot.slane %v1392_v11, %v647_v23  ;;  %v1687_v18 = vrot.slane %v1392_v11, %v651_v24  ;;  %v1689_v35 = vrot.slane %v1392_v11, %v655_v7 }
  0x38   : > { %v1433_v34 = vpop.eup %1432  ;;  %1442 = vpow2.f32 %v484_v28  ;;  %v1692_v36 = vrot.slane %v1664_v25, %v627_v12  ;;  %v1696_v40 = vrot.slane %v1664_v25, %v631_v13  ;;  %v1699_v41 = vrot.slane %v1664_v25, %v635_v20 }
  0x39   : > { %v1435_v37 = vpop.eup %1434  ;;  %v494_v38 = vcombine.high %v1433_v34, %v1433_v34  ;;  %v506_v39 = vsel %vm351_vm0, %v1433_v34, 0.0  ;;  %1444 = vpow2.f32 %v486_v29  ;;  %v1708_v14 = vrot.slane %v1664_v25, %v639_v21 }
  0x3a   : > { %v1437_v42 = vpop.eup %1436  ;;  %v495_v43 = vcombine.high %v1435_v37, %v1435_v37  ;;  %v507_v44 = vrot.slane %v506_v39, 4  ;;  %v520_v45 = vsel %vm351_vm0, %v1435_v37, 0.0  ;;  %vm677_vm2 = vcmp.eq.s32.totalorder %v1604_v17, %v1671_v27 }
  0x3b   : > { %v1439_v46 = vpop.eup %1438  ;;  %v496_v48 = vcombine.high %v1437_v42, %v1437_v42  ;;  %v513_v49 = vsel %vm351_vm0, %v494_v38, 0.0  ;;  %v521_v4 = vrot.slane %v520_v45, 4  ;;  %v534_v52 = vsel %vm351_vm0, %v1437_v42, 0.0 }
  0x3c   : > { %v497_v53 = vcombine.high %v1439_v46, %v1439_v46  ;;  %v508_v54 = vadd.f32 %v507_v44, %v506_v39  ;;  %v514_v55 = vrot.slane %v513_v49, 4  ;;  %v527_v5 = vsel %vm351_vm0, %v495_v43, 0.0 }
  0x3d   : > { %v522_v56 = vadd.f32 %v521_v4, %v520_v45  ;;  %v528_v57 = vrot.slane %v527_v5, 4  ;;  %v535_v58 = vrot.slane %v534_v52, 4  ;;  %v541_v59 = vsel %vm351_vm0, %v496_v48, 0.0 }
  0x3e   : > { %v509_v60 = vrot.slane %v508_v54, 2  ;;  %v515_v61 = vadd.f32 %v514_v55, %v513_v49  ;;  %v542_v6 = vrot.slane %v541_v59, 4  ;;  %v548_v8 = vsel %vm351_vm0, %v1439_v46, 0.0 }
  0x3f   : > { %v523_v62 = vrot.slane %v522_v56, 2  ;;  %v529_v63 = vadd.f32 %v528_v57, %v527_v5  ;;  %v536_v0 = vadd.f32 %v535_v58, %v534_v52  ;;  %v549_v1 = vrot.slane %v548_v8, 4 }
  0x40   : > { %v510_v11 = vadd.f32 %v509_v60, %v508_v54  ;;  %v516_v12 = vrot.slane %v515_v61, 2  ;;  %v543_v13 = vadd.f32 %v542_v6, %v541_v59  ;;  %v555_v7 = vsel %vm351_vm0, %v497_v53, 0.0 }
  0x41   : > { %v1441_v20 = vpop.eup %1440  ;;  %v524_v23 = vadd.f32 %v523_v62, %v522_v56  ;;  %v530_v24 = vrot.slane %v529_v63, 2  ;;  %v537_v9 = vrot.slane %v536_v0, 2  ;;  %v550_v38 = vadd.f32 %v549_v1, %v548_v8 }
  0x42   : > { %v1443_v28 = vpop.eup %1442  ;;  %v511_v29 = vrot.slane %v510_v11, 1  ;;  %v517_v34 = vadd.f32 %v516_v12, %v515_v61  ;;  %v544_v37 = vrot.slane %v543_v13, 2  ;;  %v1714_v44 = vrot.slane %v1664_v25, %v643_v22 }
  0x43   : > { %v525_v39 = vrot.slane %v524_v23, 1  ;;  %v531_v42 = vadd.f32 %v530_v24, %v529_v63  ;;  %v538_v43 = vadd.f32 %v537_v9, %v536_v0  ;;  %v1445_v21 = vpop.eup %1444  ;;  %v498_v45 = vcombine.high %v1441_v20, %v1441_v20 }
  0x44   : > { %v518_v46 = vrot.slane %v517_v34, 1  ;;  %v545_v48 = vadd.f32 %v544_v37, %v543_v13  ;;  %v551_v49 = vrot.slane %v550_v38, 2  ;;  %v499_v4 = vcombine.high %v1443_v28, %v1443_v28 }
  0x45   : > { %v532_v52 = vrot.slane %v531_v42, 1  ;;  %v539_v53 = vrot.slane %v538_v43, 1  ;;  %v556_v54 = vrot.slane %v555_v7, 4  ;;  %v512_v55 = vadd.f32 %v511_v29, %v510_v11 }
  0x46   : > { %v526_v5 = vadd.f32 %v525_v39, %v524_v23  ;;  %v552_v56 = vadd.f32 %v551_v49, %v550_v38  ;;  %v562_v57 = vsel %vm351_vm0, %v1441_v20, 0.0  ;;  %v519_v58 = vadd.f32 %v518_v46, %v517_v34 }
  0x47   : > { %v546_v59 = vrot.slane %v545_v48, 1  ;;  %v557_v60 = vadd.f32 %v556_v54, %v555_v7  ;;  %v563_v61 = vrot.slane %v562_v57, 4  ;;  %v533_v22 = vadd.f32 %v532_v52, %v531_v42 }
  0x48   : > { %v540_v25 = vadd.f32 %v539_v53, %v538_v43  ;;  %v569_v6 = vsel %vm351_vm0, %v498_v45, 0.0  ;;  %v576_v8 = vsel %vm351_vm0, %v1443_v28, 0.0  ;;  %v553_v12 = vrot.slane %v552_v56, 1 }
  0x49   : > { %v558_v62 = vrot.slane %v557_v60, 2  ;;  %v564_v63 = vadd.f32 %v563_v61, %v562_v57  ;;  %v570_v0 = vrot.slane %v569_v6, 4  ;;  %v577_v1 = vrot.slane %v576_v8, 4 }
  0x4a   : > { %v583_v11 = vsel %vm351_vm0, %v499_v4, 0.0  ;;  %v590_v13 = vsel %vm351_vm0, %v1445_v21, 0.0  ;;  %1446 = vlog2.f32 %v512_v55  ;;  %vm678_vm3 = vcmp.eq.s32.totalorder %v1604_v17, %v1675_v30 }
  0x4b   : > { %v559_v20 = vadd.f32 %v558_v62, %v557_v60  ;;  %v565_v23 = vrot.slane %v564_v63, 2  ;;  %v571_v24 = vadd.f32 %v570_v0, %v569_v6  ;;  %v578_v9 = vadd.f32 %v577_v1, %v576_v8 }
  0x4c   : > { %v547_v7 = vadd.f32 %v546_v59, %v545_v48  ;;  %v584_v28 = vrot.slane %v583_v11, 4  ;;  %v591_v29 = vrot.slane %v590_v13, 4  ;;  %1448 = vlog2.f32 %v519_v58 }
  0x4d   : > { %vm679_vm4 = vcmp.eq.s32.totalorder %v1604_v17, %v1677_v31  ;;  %vm680_vm5 = vcmp.eq.s32.totalorder %v1604_v17, %v1679_v32  ;;  %v560_v34 = vrot.slane %v559_v20, 1  ;;  %v566_v37 = vadd.f32 %v565_v23, %v564_v63 }
  0x4e   : > { %v572_v38 = vrot.slane %v571_v24, 2  ;;  %v579_v39 = vrot.slane %v578_v9, 2  ;;  %vm681_vm6 = vcmp.eq.s32.totalorder %v1604_v17, %v1683_v10  ;;  %vm682_vm7 = vcmp.eq.s32.totalorder %v1604_v17, %v1685_v33 }
  0x4f   : > { %vm683_vm8 = vcmp.eq.s32.totalorder %v1604_v17, %v1687_v18  ;;  %v554_v42 = vadd.f32 %v553_v12, %v552_v56  ;;  %v585_v43 = vadd.f32 %v584_v28, %v583_v11  ;;  %v592_v21 = vadd.f32 %v591_v29, %v590_v13 }
  0x50   : > { %1450 = vlog2.f32 %v526_v5  ;;  %vm684_vm9 = vcmp.eq.s32.totalorder %v1604_v17, %v1689_v35  ;;  %vm685_vm10 = vcmp.eq.s32.totalorder %v1604_v17, %v1692_v36  ;;  %v567_v45 = vrot.slane %v566_v37, 1 }
  0x51   : > { %v573_v46 = vadd.f32 %v572_v38, %v571_v24  ;;  %v580_v48 = vadd.f32 %v579_v39, %v578_v9  ;;  %vm686_vm11 = vcmp.eq.s32.totalorder %v1604_v17, %v1696_v40  ;;  %vm687_vm12 = vcmp.eq.s32.totalorder %v1604_v17, %v1699_v41 }
  0x52   : > { %vm688_vm13 = vcmp.eq.s32.totalorder %v1604_v17, %v1708_v14  ;;  %v805_v49 = vcombine.high %v1632_v19, %v1632_v19  ;;  %v561_v4 = vadd.f32 %v560_v34, %v559_v20  ;;  %v586_v52 = vrot.slane %v585_v43, 2 }
  0x53   : > { %v593_v53 = vrot.slane %v592_v21, 2  ;;  %1452 = vlog2.f32 %v533_v22  ;;  %v568_v54 = vadd.f32 %v567_v45, %v566_v37  ;;  %v574_v55 = vrot.slane %v573_v46, 1 }
  0x54   : > { %v581_v5 = vrot.slane %v580_v48, 1  ;;  %1454 = vlog2.f32 %v540_v25  ;;  %v587_v56 = vadd.f32 %v586_v52, %v585_v43  ;;  %v806_v58 = vcombine.high %v1635_v47, %v1635_v47  ;;  %v1447_v6 = vpop.eup %1446 }
  0x55   : > { %v594_v57 = vadd.f32 %v593_v53, %v592_v21  ;;  %1456 = vlog2.f32 %v547_v7  ;;  %v575_v59 = vadd.f32 %v574_v55, %v573_v46  ;;  %v807_v61 = vcombine.high %v1642_v50, %v1642_v50 }
  0x56   : > { %v582_v60 = vadd.f32 %v581_v5, %v580_v48  ;;  %1458 = vlog2.f32 %v554_v42  ;;  %v588_v8 = vrot.slane %v587_v56, 1  ;;  %v808_v22 = vcombine.high %v1645_v51, %v1645_v51  ;;  %v1449_v1 = vpop.eup %1448 }
  0x57   : > { %v595_v62 = vrot.slane %v594_v57, 1  ;;  %1460 = vlog2.f32 %v561_v4  ;;  %v809_v25 = vcombine.high %v1654_v15, %v1654_v15  ;;  %v810_v63 = vcombine.high %v1667_v26, %v1667_v26 }
  0x58   : > { %1462 = vlog2.f32 %v568_v54  ;;  %v817_v0 = vsel %vm677_vm2, %v1632_v19, 0.0  ;;  %v589_v12 = vadd.f32 %v588_v8, %v587_v56  ;;  %v818_v13 = vsel %vm678_vm3, %v805_v49, 0.0 }
  0x59   : > { %v596_v11 = vadd.f32 %v595_v62, %v594_v57  ;;  %1464 = vlog2.f32 %v575_v59  ;;  %vm689_vm14 = vcmp.eq.s32.totalorder %v1604_v17, %v1714_v44  ;;  %v819_v20 = vsel %vm679_vm4, %v1635_v47, 0.0 }
  0x5a   : > { %1466 = vlog2.f32 %v582_v60  ;;  %v820_v19 = vsel %vm680_vm5, %v806_v58, 0.0  ;;  %v1451_v23 = vpop.eup %1450  ;;  %v821_v24 = vsel %vm681_vm6, %v1642_v50, 0.0  ;;  %v822_v9 = vsel %vm682_vm7, %v807_v61, 0.0 }
  0x5b   : > { %1468 = vlog2.f32 %v589_v12  ;;  %v823_v47 = vsel %vm683_vm8, %v1645_v51, 0.0  ;;  %v1784_v7 = vmul.f32 0.6931472, %v1447_v6  ;;  %v1789_v28 = vsel %vm684_vm9, %v808_v22, 0.0 }
  0x5c   : > { %1470 = vlog2.f32 %v596_v11  ;;  %v1795_v50 = vsel %vm685_vm10, %v1654_v15, 0.0  ;;  %v1800_v34 = vsel %vm686_vm11, %v809_v25, 0.0  ;;  %v1806_v51 = vsel %vm687_vm12, %v1667_v26, 0.0 }
  0x5d   : > { %v1453_v29 = vpop.eup %1452  ;;  %v1811_v37 = vsel %vm688_vm13, %v810_v63, 0.0  ;;  %v1817_v15 = vsel %vm689_vm14, %v1657_v16, 0.0  ;;  %v1819_v39 = vmul.f32 0.6931472, %v1449_v1  ;;  %v830_v42 = vsel %vm351_vm0, %v817_v0, 0.0 }
  0x5e   : > { %v1455_v38 = vpop.eup %1454  ;;  %v837_v43 = vsel %vm351_vm0, %v818_v13, 0.0  ;;  %v844_v26 = vsel %vm351_vm0, %v819_v20, 0.0  ;;  %v1824_v45 = vmul.f32 0.6931472, %v1451_v23  ;;  %v831_v46 = vrot.slane %v830_v42, 4 }
  0x5f   : > { %v1457_v21 = vpop.eup %1456  ;;  %v838_v48 = vrot.slane %v837_v43, 4  ;;  %v845_v49 = vrot.slane %v844_v26, 4  ;;  %v1826_v52 = vmul.f32 0.6931472, %v1453_v29  ;;  %v851_v16 = vsel %vm351_vm0, %v820_v19, 0.0 }
  0x60   : > { %v1459_v4 = vpop.eup %1458  ;;  %v858_v53 = vsel %vm351_vm0, %v821_v24, 0.0  ;;  %v865_v54 = vsel %vm351_vm0, %v822_v9, 0.0  ;;  %v1831_v5 = vmul.f32 0.6931472, %v1455_v38  ;;  %v832_v56 = vadd.f32 %v831_v46, %v830_v42 }
  0x61   : > { %v1461_v55 = vpop.eup %1460  ;;  %v839_v57 = vadd.f32 %v838_v48, %v837_v43  ;;  %v846_v58 = vadd.f32 %v845_v49, %v844_v26  ;;  %v1833_v60 = vmul.f32 0.6931472, %v1457_v21  ;;  %v852_v61 = vrot.slane %v851_v16, 4 }
  0x62   : > { %v1463_v59 = vpop.eup %1462  ;;  %v859_v6 = vrot.slane %v858_v53, 4  ;;  %v866_v8 = vrot.slane %v865_v54, 4  ;;  %v1835_v22 = vmul.f32 0.6931472, %v1459_v4  ;;  %v833_v25 = vrot.slane %v832_v56, 2 }
  0x63   : > { %v1465_v62 = vpop.eup %1464  ;;  %v840_v63 = vrot.slane %v839_v57, 2  ;;  %v847_v0 = vrot.slane %v846_v58, 2  ;;  %v1837_v12 = vmul.f32 0.6931472, %v1461_v55  ;;  %v853_v11 = vadd.f32 %v852_v61, %v851_v16 }
  0x64   : > { %v1467_v1 = vpop.eup %1466  ;;  %v860_v13 = vadd.f32 %v859_v6, %v858_v53  ;;  %v867_v20 = vadd.f32 %v866_v8, %v865_v54  ;;  %v1839_v23 = vmul.f32 0.6931472, %v1463_v59  ;;  %v834_v24 = vadd.f32 %v833_v25, %v832_v56 }
  0x65   : > { %v1469_v19 = vpop.eup %1468  ;;  %v841_v9 = vadd.f32 %v840_v63, %v839_v57  ;;  %v848_v29 = vadd.f32 %v847_v0, %v846_v58  ;;  %v1841_v42 = vmul.f32 0.6931472, %v1465_v62  ;;  %v854_v43 = vrot.slane %v853_v11, 2 }
  0x66   : > { %v1471_v38 = vpop.eup %1470  ;;  %v861_v26 = vrot.slane %v860_v13, 2  ;;  %v868_v21 = vrot.slane %v867_v20, 2  ;;  %v1843_v46 = vmul.f32 0.6931472, %v1467_v1  ;;  %v835_v48 = vrot.slane %v834_v24, 1 }
  0x67   : > { %v842_v49 = vrot.slane %v841_v9, 1  ;;  %v849_v4 = vrot.slane %v848_v29, 1  ;;  %v855_v16 = vadd.f32 %v854_v43, %v853_v11  ;;  %v872_v55 = vsel %vm351_vm0, %v823_v47, 0.0 }
  0x68   : > { %v862_v53 = vadd.f32 %v861_v26, %v860_v13  ;;  %v869_v54 = vadd.f32 %v868_v21, %v867_v20  ;;  %v1846_v59 = vmul.f32 0.6931472, %v1469_v19  ;;  %v1848_v56 = vmul.f32 0.6931472, %v1471_v38 }
  0x69   : > { %v873_v57 = vrot.slane %v872_v55, 4  ;;  %v1850_v58 = vadd.f32 %v835_v48, %v834_v24  ;;  %v1852_v61 = vadd.f32 %v842_v49, %v841_v9  ;;  %v1854_v6 = vadd.f32 %v849_v4, %v848_v29 }
  0x6a   : > { %2109 = vst [vmem:[#allocation3_spill] sm:$0xff] %v1848_v56  ;;  %v879_v8 = vsel %vm351_vm0, %v1789_v28, 0.0  ;;  %v886_v63 = vsel %vm351_vm0, %v1795_v50, 0.0  ;;  %v893_v47 = vsel %vm351_vm0, %v1800_v34, 0.0  ;;  %v856_v0 = vrot.slane %v855_v16, 1 }
  0x6b   : > { %v874_v62 = vadd.f32 %v873_v57, %v872_v55  ;;  %v880_v25 = vrot.slane %v879_v8, 4  ;;  %v863_v1 = vrot.slane %v862_v53, 1  ;;  %v870_v11 = vrot.slane %v869_v54, 1 }
  0x6c   : > { %v887_v13 = vrot.slane %v886_v63, 4  ;;  %v894_v24 = vrot.slane %v893_v47, 4  ;;  %v900_v9 = vsel %vm351_vm0, %v1806_v51, 0.0  ;;  %v907_v38 = vsel %vm351_vm0, %v1811_v37, 0.0 }
  0x6d   : > { %v875_v20 = vrot.slane %v874_v62, 2  ;;  %v881_v19 = vadd.f32 %v880_v25, %v879_v8  ;;  %v901_v28 = vrot.slane %v900_v9, 4  ;;  %v914_v50 = vsel %vm351_vm0, %v1817_v15, 0.0 }
  0x6e   : > { %v888_v29 = vadd.f32 %v887_v13, %v886_v63  ;;  %v895_v26 = vadd.f32 %v894_v24, %v893_v47  ;;  %v908_v21 = vrot.slane %v907_v38, 4  ;;  %v1868_v48 = vadd.f32 %v856_v0, %v855_v16 }
  0x6f   : > { %v876_v43 = vadd.f32 %v875_v20, %v874_v62  ;;  %v882_v34 = vrot.slane %v881_v19, 2  ;;  %v902_v4 = vadd.f32 %v901_v28, %v900_v9  ;;  %v915_v55 = vrot.slane %v914_v50, 4 }
  0x70   : > { %v889_v49 = vrot.slane %v888_v29, 2  ;;  %v896_v51 = vrot.slane %v895_v26, 2  ;;  %v909_v25 = vadd.f32 %v908_v21, %v907_v38  ;;  %v1870_v63 = vadd.f32 %v863_v1, %v862_v53 }
  0x71   : > { %v877_v57 = vrot.slane %v876_v43, 1  ;;  %v883_v8 = vadd.f32 %v882_v34, %v881_v19  ;;  %v903_v37 = vrot.slane %v902_v4, 2  ;;  %v916_v2 = vadd.f32 %v915_v55, %v914_v50 }
  0x72   : > { %v890_v13 = vadd.f32 %v889_v49, %v888_v29  ;;  %v1872_v3 = vadd.f32 %v870_v11, %v869_v54  ;;  %v897_v62 = vadd.f32 %v896_v51, %v895_v26  ;;  %v910_v47 = vrot.slane %v909_v25, 2 }
  0x73   : > { %v884_v15 = vrot.slane %v883_v8, 1  ;;  %v1874_v20 = vadd.f32 %v877_v57, %v876_v43  ;;  %v904_v0 = vadd.f32 %v903_v37, %v902_v4  ;;  %v917_v24 = vrot.slane %v916_v2, 2 }
  0x74   : > { %v891_v16 = vrot.slane %v890_v13, 1  ;;  %v898_v19 = vrot.slane %v897_v62, 1  ;;  %v911_v28 = vadd.f32 %v910_v47, %v909_v25 }
  0x75   : > { %v1876_v9 = vadd.f32 %v884_v15, %v883_v8  ;;  %v905_v29 = vrot.slane %v904_v0, 1  ;;  %v918_v54 = vadd.f32 %v917_v24, %v916_v2 }
  0x76   : > { %v1880_v1 = vadd.f32 %v891_v16, %v890_v13  ;;  %v1884_v38 = vadd.f32 %v898_v19, %v897_v62  ;;  %v912_v50 = vrot.slane %v911_v28, 1  ;;  %v1498_v62 = vmov 1966171168  }
  0x77   : > { %v1890_v26 = vadd.f32 %v905_v29, %v904_v0  ;;  %v919_v21 = vrot.slane %v918_v54, 1  ;;  %v1023_v47 = vunpack.c.l.s4 %v1498_v62  ;;  %v2112_v16 = vlaneseq }
  0x78   : > { %v1896_v4 = vadd.f32 %v912_v50, %v911_v28 }
  0x79   : > { %v1904_v51 = vadd.f32 %v919_v21, %v918_v54  ;;  %v924_v0 = vand.u32 127, %v2112_v16  ;;  %v1024_v24 = vunpack.c.0.s8 %v1023_v47 }
  0x7a   : > { %2110 = vst [vmem:[#allocation4_spill] sm:$0xff] %v1896_v4 }
  0x7b   : > { %2111 = vst [vmem:[#allocation5_spill] sm:$0xff] %v1904_v51  ;;  %v1915_v28 = vadd.s32 1536, %v924_v0  ;;  %v1918_v29 = vsub.s32 %v1024_v24, %v1604_v17 }
  0x7d   : > { %vm963_vm15 = vcmp.lt.s32.totalorder %v1915_v28, 1640 }
  0x8f   : > { %v693_v19 = vpop.permute.xlu0 %692 }
  0x90   : > { %v695_v54 = vsel %vm677_vm2, %v693_v19, 0.0  ;;  %v696_v50 = vsel %vm678_vm3, %v693_v19, 0.0  ;;  %v697_v21 = vsel %vm679_vm4, %v693_v19, 0.0  ;;  %v698_v62 = vsel %vm680_vm5, %v693_v19, 0.0 }
  0x91   : > { %v699_v47 = vsel %vm681_vm6, %v693_v19, 0.0  ;;  %v700_v27 = vsel %vm682_vm7, %v693_v19, 0.0  ;;  %v701_v30 = vsel %vm683_vm8, %v693_v19, 0.0  ;;  %v702_v31 = vsel %vm684_vm9, %v693_v19, 0.0 }
  0x92   : > { %v703_v32 = vsel %vm685_vm10, %v693_v19, 0.0  ;;  %v704_v10 = vsel %vm686_vm11, %v693_v19, 0.0  ;;  %v705_v33 = vsel %vm687_vm12, %v693_v19, 0.0  ;;  %v1956_v18 = vsel %vm688_vm13, %v693_v19, 0.0 }
  0x93   : > { %v1961_v35 = vsel %vm689_vm14, %v693_v19, 0.0  ;;  %v708_v36 = vsel %vm351_vm0, %v695_v54, 0.0  ;;  %v715_v16 = vsel %vm351_vm0, %v696_v50, 0.0  ;;  %v722_v40 = vsel %vm351_vm0, %v697_v21, 0.0 }
  0x94   : > { %v709_v0 = vrot.slane %v708_v36, 4  ;;  %v716_v24 = vrot.slane %v715_v16, 4  ;;  %v723_v41 = vrot.slane %v722_v40, 4  ;;  %v729_v15 = vsel %vm351_vm0, %v698_v62, 0.0 }
  0x95   : > { %v730_v37 = vrot.slane %v729_v15, 4  ;;  %v736_v14 = vsel %vm351_vm0, %v699_v47, 0.0  ;;  %v743_v13 = vsel %vm351_vm0, %v700_v27, 0.0  ;;  %v750_v17 = vsel %vm351_vm0, %v701_v30, 0.0 }
  0x96   : > { %v710_v44 = vadd.f32 %v709_v0, %v708_v36  ;;  %v717_v19 = vadd.f32 %v716_v24, %v715_v16  ;;  %v724_v25 = vadd.f32 %v723_v41, %v722_v40  ;;  %v737_v54 = vrot.slane %v736_v14, 4 }
  0x97   : > { %v731_v8 = vadd.f32 %v730_v37, %v729_v15  ;;  %v744_v50 = vrot.slane %v743_v13, 4  ;;  %v751_v57 = vrot.slane %v750_v17, 4  ;;  %v757_v21 = vsel %vm351_vm0, %v702_v31, 0.0 }
  0x98   : > { %v711_v55 = vrot.slane %v710_v44, 2  ;;  %v718_v2 = vrot.slane %v717_v19, 2  ;;  %v725_v49 = vrot.slane %v724_v25, 2  ;;  %v738_v62 = vadd.f32 %v737_v54, %v736_v14 }
  0x99   : > { %v732_v34 = vrot.slane %v731_v8, 2  ;;  %v745_v43 = vadd.f32 %v744_v50, %v743_v13  ;;  %v752_v47 = vadd.f32 %v751_v57, %v750_v17  ;;  %v758_v11 = vrot.slane %v757_v21, 4 }
  0x9a   : > { %v712_v27 = vadd.f32 %v711_v55, %v710_v44  ;;  %v719_v53 = vadd.f32 %v718_v2, %v717_v19  ;;  %v726_v30 = vadd.f32 %v725_v49, %v724_v25  ;;  %v739_v36 = vrot.slane %v738_v62, 2 }
  0x9b   : > { %v733_v16 = vadd.f32 %v732_v34, %v731_v8  ;;  %v746_v40 = vrot.slane %v745_v43, 2  ;;  %v753_v0 = vrot.slane %v752_v47, 2  ;;  %v759_v37 = vadd.f32 %v758_v11, %v757_v21 }
  0x9c   : > { %v713_v15 = vrot.slane %v712_v27, 1  ;;  %v720_v24 = vrot.slane %v719_v53, 1  ;;  %v727_v41 = vrot.slane %v726_v30, 1  ;;  %v740_v31 = vadd.f32 %v739_v36, %v738_v62 }
  0x9d   : > { %v734_v51 = vrot.slane %v733_v16, 1  ;;  %v747_v56 = vadd.f32 %v746_v40, %v745_v43  ;;  %v754_v4 = vadd.f32 %v753_v0, %v752_v47  ;;  %v760_v14 = vrot.slane %v759_v37, 2 }
  0x9e   : > { %v1971_v54 = vadd.f32 %v713_v15, %v712_v27  ;;  %v1973_v57 = vadd.f32 %v720_v24, %v719_v53  ;;  %v1975_v55 = vadd.f32 %v727_v41, %v726_v30  ;;  %v741_v49 = vrot.slane %v740_v31, 1 }
  0x9f   : > { %v1977_v2 = vadd.f32 %v734_v51, %v733_v16  ;;  %v748_v34 = vrot.slane %v747_v56, 1  ;;  %v755_v8 = vrot.slane %v754_v4, 1  ;;  %v761_v11 = vadd.f32 %v760_v14, %v759_v37 }
  0xa0   : > { %v1979_v25 = vadd.f32 %v741_v49, %v740_v31  ;;  %v764_v13 = vsel %vm351_vm0, %v703_v32, 0.0  ;;  %v771_v43 = vsel %vm351_vm0, %v704_v10, 0.0  ;;  %v778_v17 = vsel %vm351_vm0, %v705_v33, 0.0 }
  0xa1   : > { %v1984_v44 = vadd.f32 %v748_v34, %v747_v56  ;;  %v1986_v53 = vadd.f32 %v755_v8, %v754_v4  ;;  %v762_v19 = vrot.slane %v761_v11, 1  ;;  %v765_v50 = vrot.slane %v764_v13, 4 }
  0xa2   : > { %v772_v21 = vrot.slane %v771_v43, 4  ;;  %v779_v51 = vrot.slane %v778_v17, 4  ;;  %v785_v62 = vsel %vm351_vm0, %v1956_v18, 0.0  ;;  %v792_v47 = vsel %vm351_vm0, %v1961_v35, 0.0 }
  0xa3   : > { %v1992_v27 = vadd.f32 %v762_v19, %v761_v11  ;;  %v766_v32 = vadd.f32 %v765_v50, %v764_v13  ;;  %v786_v10 = vrot.slane %v785_v62, 4  ;;  %v793_v30 = vrot.slane %v792_v47, 4 }
  0xa4   : > { %v773_v33 = vadd.f32 %v772_v21, %v771_v43  ;;  %v780_v56 = vadd.f32 %v779_v51, %v778_v17  ;;  %v2113_v4 = vsub.f32 %v1784_v7, %v1850_v58  ;;  %v2114_v18 = vsub.f32 %v1819_v39, %v1852_v61 }
  0xa5   : > { %v767_v35 = vrot.slane %v766_v32, 2  ;;  %v787_v40 = vadd.f32 %v786_v10, %v785_v62  ;;  %v794_v0 = vadd.f32 %v793_v30, %v792_v47  ;;  %v2115_v37 = vsub.f32 %v1824_v45, %v1854_v6 }
  0xa6   : > { %v979_v36 = vmul.f32 %v2113_v4, %v1971_v54  ;;  %v980_v16 = vmul.f32 %v2114_v18, %v1973_v57  ;;  %v774_v24 = vrot.slane %v773_v33, 2  ;;  %v781_v41 = vrot.slane %v780_v56, 2 }
  0xa7   : > { %v981_v15 = vmul.f32 %v2115_v37, %v1975_v55  ;;  %v2116_v7 = vsub.f32 %v1826_v52, %v1868_v48  ;;  %v2117_v39 = vsub.f32 %v1831_v5, %v1870_v63  ;;  %v768_v31 = vadd.f32 %v767_v35, %v766_v32 }
  0xa8   : > { %v788_v14 = vrot.slane %v787_v40, 2  ;;  %v795_v49 = vrot.slane %v794_v0, 2  ;;  %v2118_v45 = vsub.f32 %v1833_v60, %v1872_v3  ;;  %v775_v34 = vadd.f32 %v774_v24, %v773_v33  ;;  %v2126_v24 = vld [vmem:[#allocation3_spill] sm:$0xff] }
  0xa9   : > { %v982_v58 = vmul.f32 %v2116_v7, %v1977_v2  ;;  %v983_v61 = vmul.f32 %v2117_v39, %v1979_v25  ;;  %v782_v8 = vadd.f32 %v781_v41, %v780_v56  ;;  %v2119_v52 = vsub.f32 %v1835_v22, %v1874_v20 }
  0xaa   : > { %v984_v6 = vmul.f32 %v2118_v45, %v1984_v44  ;;  %v2120_v5 = vsub.f32 %v1837_v12, %v1876_v9  ;;  %v769_v11 = vrot.slane %v768_v31, 1  ;;  %v789_v13 = vadd.f32 %v788_v14, %v787_v40 }
  0xab   : > { %v985_v48 = vmul.f32 %v2119_v52, %v1986_v53  ;;  %v796_v43 = vadd.f32 %v795_v49, %v794_v0  ;;  %v1018_v17 = vcombine.low %v979_v36, %v980_v16  ;;  %v776_v19 = vrot.slane %v775_v34, 1  ;;  %v2124_v0 = vld [vmem:[#allocation4_spill] sm:$0xff] }
  0xac   : > { %v986_v63 = vmul.f32 %v2120_v5, %v1992_v27  ;;  %v783_v50 = vrot.slane %v782_v8, 1  ;;  %v1019_v3 = vcombine.low %v981_v15, %v982_v58  ;;  %v1020_v60 = vcombine.low %v983_v61, %v984_v6 }
  0xad   : > { %v770_v21 = vadd.f32 %v769_v11, %v768_v31  ;;  %v790_v51 = vrot.slane %v789_v13, 1  ;;  %v797_v62 = vrot.slane %v796_v43, 1  ;;  %v777_v32 = vadd.f32 %v776_v19, %v775_v34 }
  0xae   : > { %v1021_v47 = vcombine.low %v985_v48, %v986_v63  ;;  %v784_v22 = vadd.f32 %v783_v50, %v782_v8  ;;  %v1028_v20 = vrot.slane %v1018_v17, %v1918_v29  ;;  %v1035_v10 = vrot.slane %v1019_v3, %v1918_v29 }
  0xaf   : > { %v791_v12 = vadd.f32 %v790_v51, %v789_v13  ;;  %v798_v9 = vadd.f32 %v797_v62, %v796_v43  ;;  %v2121_v30 = vsub.f32 %v1839_v23, %v1880_v1  ;;  %v1042_v56 = vrot.slane %v1020_v60, %v1918_v29  ;;  %v2127_v23 = vld [vmem:[#allocation5_spill] sm:$0xff]  ;;  %v965_v43 = vld [vmem:[%s1561_s28 + $0x8] sm:$0x1f] }
  0xb0   : > { %v2122_v4 = vsub.f32 %v1841_v42, %v1884_v38  ;;  %v2123_v18 = vsub.f32 %v1843_v46, %v1890_v26  ;;  %v1049_v35 = vrot.slane %v1021_v47, %v1918_v29  ;;  %v1050_v40 = vcombine.low %v1028_v20, %v1035_v10  ;;  %v1117_v51 = vld [vmem:[%s1576_s5 + $0x8] sm:$0x1f] }
  0xb1   : > { %v987_v33 = vmul.f32 %v2121_v30, %v770_v21  ;;  %v2125_v37 = vsub.f32 %v1846_v59, %v2124_v0  ;;  %v2128_v1 = vsub.f32 %v2126_v24, %v2127_v23  ;;  %v1130_v7 = vsel %vm963_vm15, %v798_v9, 0.0 }
  0xb2   : > { %v988_v36 = vmul.f32 %v2122_v4, %v777_v32  ;;  %v989_v16 = vmul.f32 %v2123_v18, %v784_v22  ;;  %v1144_v42 = vcombine.low %v1971_v54, %v1973_v57  ;;  %v1051_v38 = vcombine.low %v1042_v56, %v1049_v35 }
  0xb3   : > { %v990_v15 = vmul.f32 %v2125_v37, %v791_v12  ;;  %v991_v41 = vmul.f32 %v2128_v1, %v798_v9  ;;  %v1058_v46 = vrot.slane %v1050_v40, %v1918_v29  ;;  %v1145_v58 = vcombine.low %v1975_v55, %v1977_v2 }
  0xb4   : > { %v1067_v26 = vcombine.low %v987_v33, %v988_v36  ;;  %v1146_v61 = vcombine.low %v1979_v25, %v1984_v44  ;;  %v1147_v31 = vcombine.low %v1986_v53, %v1992_v27  ;;  %v1065_v14 = vrot.slane %v1051_v38, %v1918_v29 }
  0xb5   : > { %v1004_v59 = vsel %vm963_vm15, %v991_v41, 0.0  ;;  %v1068_v39 = vcombine.low %v989_v16, %v990_v15  ;;  %v1154_v49 = vrot.slane %v1144_v42, %v1918_v29  ;;  %v1161_v28 = vrot.slane %v1145_v58, %v1918_v29 }
  0xb6   : > { %v1075_v54 = vrot.slane %v1067_v26, %v1918_v29  ;;  %v1089_v57 = vrot.slane %v1004_v59, %v1918_v29  ;;  %v1168_v2 = vrot.slane %v1146_v61, %v1918_v29  ;;  %v1175_v25 = vrot.slane %v1147_v31, %v1918_v29 }
  0xb7   : > { %v1082_v55 = vrot.slane %v1068_v39, %v1918_v29  ;;  %v1066_v44 = vcombine.low %v1058_v46, %v1065_v14  ;;  %v1193_v53 = vcombine.low %v770_v21, %v777_v32  ;;  %v1194_v27 = vcombine.low %v784_v22, %v791_v12 }
  0xb8   : > { %v1176_v6 = vcombine.low %v1154_v49, %v1161_v28  ;;  %v1177_v34 = vcombine.low %v1168_v2, %v1175_v25  ;;  %v1215_v48 = vrot.slane %v1130_v7, %v1918_v29  ;;  %v1104_v63 = vrot.slane %v1089_v57, %v1918_v29 }
  0xb9   : > { %v1090_v45 = vcombine.low %v1075_v54, %v1082_v55  ;;  %v1201_v8 = vrot.slane %v1193_v53, %v1918_v29  ;;  %v1208_v52 = vrot.slane %v1194_v27, %v1918_v29  ;;  %1110 = vst [vmem:[%s1561_s28] sm:$0xff] %v1066_v44 }
  0xba   : > { %v1184_v11 = vrot.slane %v1176_v6, %v1918_v29  ;;  %v1191_v13 = vrot.slane %v1177_v34, %v1918_v29  ;;  %v1230_v60 = vrot.slane %v1215_v48, %v1918_v29 }
  0xbb   : > { %v1097_v5 = vrot.slane %v1090_v45, %v1918_v29  ;;  %v1216_v17 = vcombine.low %v1201_v8, %v1208_v52 }
  0xbc   : > { %v1192_v50 = vcombine.low %v1184_v11, %v1191_v13 }
  0xbd   : > { %v1105_v19 = vcombine.low %v1097_v5, %v1104_v63  ;;  %v1223_v3 = vrot.slane %v1216_v17, %v1918_v29 }
  0xbe   : > { %1236 = vst [vmem:[%s1576_s5] sm:$0xff] %v1192_v50 }
  0xbf   : > { %v1109_v21 = vadd.f32 %v1105_v19, %v965_v43  ;;  %v1231_v62 = vcombine.low %v1223_v3, %v1230_v60 }
  0xc1   : > { %1115 = vst.msk [vmem:[%s1561_s28 + $0x8] sm:$0x1f] %vm1553_vm1, %v1109_v21  ;;  %v1235_v32 = vadd.f32 %v1231_v62, %v1117_v51 }
  0xc3   : > { %1237 = vst.msk [vmem:[%s1576_s5 + $0x8] sm:$0x1f] %vm1553_vm1, %v1235_v32 }
  0xc4 PF: > { %s15_s17 = sadd.s32 1, %s1494_s17   ;;  %s2130_s15 = smov %s1490_s16 }
  0xc5   : > { %p12_p5 = scmp.ge.s32.totalorder %s15_s17, 4   ;;  %s2131_s16 = smov %s2133_s18 }
  0xc7   :  { %14 = sbr.rel (!%p12_p5) target bundleno = 2 (0x2), region = 81 }

</bundles_post_ra>
